<compile_context>
chip_gen: v5e
topology: v5e:2x2
jax: 0.10.0
libtpu: 0.0.40
codegen_flags: <defaults>
</compile_context>

<pallas_src>
import functools

import jax
import jax.numpy as jnp
from jax import lax
from jax.experimental import pallas as pl
from jax.experimental.pallas import tpu as pltpu

_LANES = 128           # vreg lane width
_MAX_TILE_ROWS = 2048  # default production tile; multiple of 32 (int8 labels tiling)


def _cdiv(a, b):
    return -(-a // b)


def _round_up(a, b):
    return _cdiv(a, b) * b


def _layout(n, min_rows, max_rows):
    """(rows_in_kernel, tail_elems, tile_rows, n_tiles) for one flattened input group."""
    rows = n // _LANES
    tail = n - rows * _LANES
    if rows == 0:
        return 0, tail, min_rows, 1            # dummy block; all rows masked off in-kernel
    tile_rows = min(max_rows, _round_up(rows, min_rows))
    return rows, tail, tile_rows, _cdiv(rows, tile_rows)


def _split(flat, rows):
    """Lane-dense (rows,128) head (or None) and ragged <128-elem tail (or None). No padding."""
    n = flat.size
    head_n = rows * _LANES
    if rows == 0:
        return None, flat
    head = (flat if head_n == n else flat[:head_n]).reshape(rows, _LANES)
    tail = None if head_n == n else flat[head_n:]
    return head, tail


def _loss_kernel(p_ref, y_ref, r_ref, mu_ref, lv_ref, acc_ref, *,
                 rows_bce, rows_rec, rows_kl, n_steps, inv_n_bce, inv_n_kl):
    i = pl.program_id(0)

    # Output block (8,128) is revisited on every step of the single "arbitrary" axis ->
    # stays resident in VMEM and acts as the f32 accumulator.
    @pl.when(i == 0)
    def _init():
        acc_ref[...] = jnp.zeros_like(acc_ref)

    def fold(term, full_rows):
        # Zero out rows past this group's extent (ragged last tile, or steps past the group's
        # tile count whose clamped index_map re-presents stale data), then fold to one (8,128)
        # vreg using VPU adds only; the single cross-lane reduce happens in the tiny epilogue.
        tile_rows = term.shape[0]
        if full_rows < n_steps * tile_rows:            # static: mask only when needed
            row = lax.broadcasted_iota(jnp.int32, term.shape, 0)
            term = jnp.where(i * tile_rows + row < full_rows, term, 0.0)
        return jnp.sum(term.reshape(tile_rows // 8, 8, _LANES), axis=0)

    # ---- loss0: BCELoss(output, labels.float()), mean reduction, PyTorch -100 log clamp
    p = p_ref[...].astype(jnp.float32)
    y = y_ref[...].astype(jnp.float32)
    log_p = jnp.maximum(jnp.log(p), -100.0)
    log_1mp = jnp.maximum(jnp.log(1.0 - p), -100.0)
    bce = -(y * log_p + (1.0 - y) * log_1mp)
    total = inv_n_bce * fold(bce, rows_bce)

    # ---- loss1: 0.01 * recon_loss.sum()
    total = total + 0.01 * fold(r_ref[...].astype(jnp.float32), rows_rec)

    # ---- loss2: -0.5 * mean(1 + logvar - mu^2 - exp(logvar))
    mu = mu_ref[...].astype(jnp.float32)
    lv = lv_ref[...].astype(jnp.float32)
    kl = 1.0 + lv - mu * mu - jnp.exp(lv)
    total = total + (-0.5 * inv_n_kl) * fold(kl, rows_kl)

    # Single accumulator RMW per grid step.
    acc_ref[...] = acc_ref[...] + total


def my_loss_function(output, recon_loss, mu, logvar, labels, *,
                     max_tile_rows=_MAX_TILE_ROWS):
    """Pallas TPU implementation of MyLossFunction.forward -> scalar float32."""
    assert labels.size == output.size, "BCELoss requires labels and output to match"
    assert logvar.size == mu.size

    n_bce, n_rec, n_kl = output.size, recon_loss.size, mu.size
    max_tile_rows = max(32, (int(max_tile_rows) // 32) * 32)

    # Per-group layouts. The BCE group carries int8 labels -> 32-row granularity; the pure-f32
    # groups only need 8-row granularity and get their own (possibly much smaller) tile.
    rows_bce, tail_bce_n, tr_bce, nt_bce = _layout(n_bce, 32, max_tile_rows)
    rows_rec, tail_rec_n, tr_rec, nt_rec = _layout(n_rec, 8, max_tile_rows)
    rows_kl,  tail_kl_n,  tr_kl,  nt_kl = _layout(n_kl, 8, max_tile_rows)
    n_steps = max(nt_bce, nt_rec, nt_kl)

    p_head, p_tail = _split(jnp.ravel(output), rows_bce)
    y_head, y_tail = _split(jnp.ravel(labels), rows_bce)
    r_head, r_tail = _split(jnp.ravel(recon_loss), rows_rec)
    mu_head, mu_tail = _split(jnp.ravel(mu), rows_kl)
    lv_head, lv_tail = _split(jnp.ravel(logvar), rows_kl)

    # Groups smaller than one lane-dense row go fully through the plain-JAX tail path; the
    # kernel gets a tiny dummy block whose row mask is all-false.
    if p_head is None:
        p_head = jnp.zeros((tr_bce, _LANES), output.dtype)
        y_head = jnp.zeros((tr_bce, _LANES), labels.dtype)
    if r_head is None:
        r_head = jnp.zeros((tr_rec, _LANES), recon_loss.dtype)
    if mu_head is None:
        mu_head = jnp.zeros((tr_kl, _LANES), mu.dtype)
        lv_head = jnp.zeros((tr_kl, _LANES), logvar.dtype)

    kernel = functools.partial(
        _loss_kernel,
        rows_bce=rows_bce, rows_rec=rows_rec, rows_kl=rows_kl,
        n_steps=n_steps, inv_n_bce=1.0 / n_bce, inv_n_kl=1.0 / n_kl)

    def idx(tiles):
        if tiles == n_steps:
            return lambda i: (i, 0)
        # Exhausted groups keep returning their last block (no re-DMA for an unchanged block);
        # their rows are masked off inside the kernel, so this is perf-only.
        return lambda i: (jnp.minimum(i, tiles - 1), 0)

    in_bytes = sum(a.size * a.dtype.itemsize
                   for a in (p_head, y_head, r_head, mu_head, lv_head))

    # NOTE: a v7x-only CORE_PARALLEL split of the reduction axis across both TensorCores could
    # be added here once verified with a trace; on single-TC v5e/v6e it is pure overhead.
    partial_sums = pl.pallas_call(
        kernel,
        out_shape=jax.ShapeDtypeStruct((8, _LANES), jnp.float32),
        grid_spec=pltpu.PrefetchScalarGridSpec(
            num_scalar_prefetch=0,
            grid=(n_steps,),
            in_specs=[
                pl.BlockSpec((tr_bce, _LANES), idx(nt_bce)),   # output (probabilities)
                pl.BlockSpec((tr_bce, _LANES), idx(nt_bce)),   # labels (int8 ok; cast in-kernel)
                pl.BlockSpec((tr_rec, _LANES), idx(nt_rec)),   # recon_loss
                pl.BlockSpec((tr_kl, _LANES), idx(nt_kl)),     # mu
                pl.BlockSpec((tr_kl, _LANES), idx(nt_kl)),     # logvar
            ],
            out_specs=pl.BlockSpec((8, _LANES), lambda i: (0, 0)),
        ),
        compiler_params=pltpu.CompilerParams(
            dimension_semantics=("arbitrary",)),
        cost_estimate=pl.CostEstimate(
            flops=8 * n_bce + 2 * n_rec + 6 * n_kl,
            transcendentals=2 * n_bce + n_kl,
            bytes_accessed=in_bytes + 8 * _LANES * 4),
    )(p_head, y_head, r_head, mu_head, lv_head)

    # Tiny epilogue: one cross-lane reduce of the (8,128) accumulator.
    loss = jnp.sum(partial_sums)

    # Sub-128-element ragged tails (plain JAX; no work at all when sizes are multiples of 128).
    if p_tail is not None:
        pt = p_tail.astype(jnp.float32)
        yt = y_tail.astype(jnp.float32)
        bt = -(yt * jnp.maximum(jnp.log(pt), -100.0)
               + (1.0 - yt) * jnp.maximum(jnp.log(1.0 - pt), -100.0))
        loss = loss + jnp.sum(bt) / n_bce
    if r_tail is not None:
        loss = loss + 0.01 * jnp.sum(r_tail.astype(jnp.float32))
    if mu_tail is not None:
        mt = mu_tail.astype(jnp.float32)
        lt = lv_tail.astype(jnp.float32)
        loss = loss + (-0.5 / n_kl) * jnp.sum(1.0 + lt - mt * mt - jnp.exp(lt))
    return loss


if __name__ == "__main__":
    key = jax.random.PRNGKey(0)
    k0, k1, k2, k3, k4 = jax.random.split(key, 5)

    # batch=32, output dim=512, recon dim=501 (deliberately ragged to exercise the tail path
    # and the in-kernel row mask), latent dim=64.
    B, C, R, Z = 32, 512, 501, 64

    # output: probabilities in (0, 1) (as expected by BCELoss)
    output = jax.nn.sigmoid(jax.random.normal(k0, (B, C), dtype=jnp.float32))
    # labels: binary, passed as int8 (narrow dtype -> fewer HBM bytes; kernel applies .float())
    labels = jax.random.bernoulli(k1, 0.5, (B, C)).astype(jnp.int8)
    # per-element reconstruction losses
    recon_loss = jax.random.uniform(k2, (B, R), dtype=jnp.float32)
    # VAE posterior parameters
    mu = jax.random.normal(k3, (B, Z), dtype=jnp.float32)
    logvar = 0.1 * jax.random.normal(k4, (B, Z), dtype=jnp.float32)

    # max_tile_rows=32 only so this SMALL demo exercises multi-step accumulation, per-group
    # tile shapes, the clamped index_map and the ragged-row mask; production uses the
    # 2048-row default.
    fn = jax.jit(functools.partial(my_loss_function, max_tile_rows=32))
    loss = fn(output, recon_loss, mu, logvar, labels)
    jax.block_until_ready(loss)

    # sanity check vs. plain-JAX reference of the PyTorch math
    y = labels.astype(jnp.float32)
    ref_bce = jnp.mean(-(y * jnp.maximum(jnp.log(output), -100.0)
                         + (1.0 - y) * jnp.maximum(jnp.log(1.0 - output), -100.0)))
    ref = (ref_bce + 0.01 * jnp.sum(recon_loss)
           - 0.5 * jnp.mean(1.0 + logvar - mu ** 2 - jnp.exp(logvar)))
    assert jnp.allclose(loss, ref, rtol=1e-5, atol=1e-5), (float(loss), float(ref))

    print("KERNEL_OK")
</pallas_src>

<mosaic_0001>
module attributes {stable_mosaic.version = 11 : i64} {
  func.func @_loss_kernel(%arg0: i32, %arg1: memref<32x128xf32, #tpu.memory_space<vmem>>, %arg2: memref<32x128xi8, #tpu.memory_space<vmem>>, %arg3: memref<32x128xf32, #tpu.memory_space<vmem>>, %arg4: memref<16x128xf32, #tpu.memory_space<vmem>>, %arg5: memref<16x128xf32, #tpu.memory_space<vmem>>, %arg6: memref<8x128xf32, #tpu.memory_space<vmem>>) attributes {dimension_semantics = [#tpu.dimension_semantics<arbitrary>], iteration_bounds = array<i64: 4>, scalar_prefetch = 0 : i64, scratch_operands = 0 : i64, tpu.core_type = #tpu.core_type<tc>, window_params = [{transform_indices = @transform_0, window_bounds = array<i64: 32, 128>}, {transform_indices = @transform_1, window_bounds = array<i64: 32, 128>}, {transform_indices = @transform_2, window_bounds = array<i64: 32, 128>}, {transform_indices = @transform_3, window_bounds = array<i64: 16, 128>}, {transform_indices = @transform_4, window_bounds = array<i64: 16, 128>}, {pipeline_mode = #tpu.pipeline_mode<synchronous>, transform_indices = @transform_5, window_bounds = array<i64: 8, 128>}]} {
    %c0_i32 = arith.constant 0 : i32
    %0 = arith.cmpi eq, %arg0, %c0_i32 : i32
    %1 = arith.extui %0 : i1 to i32
    %c0_i32_0 = arith.constant 0 : i32
    %2 = arith.cmpi ne, %1, %c0_i32_0 : i32
    scf.if %2 {
      %cst_28 = arith.constant 0.000000e+00 : f32
      %63 = vector.broadcast %cst_28 : f32 to vector<8x128xf32>
      %c0_29 = arith.constant 0 : index
      %c0_30 = arith.constant 0 : index
      %64 = vector.load %arg6[%c0_29, %c0_30] : memref<8x128xf32, #tpu.memory_space<vmem>>, vector<8x128xf32>
      tpu.vector_store %arg6[%c0_29, %c0_30], %63 {strides = array<i32>} : memref<8x128xf32, #tpu.memory_space<vmem>>, vector<8x128xf32>,
    } else {
    }
    %c0 = arith.constant 0 : index
    %c0_1 = arith.constant 0 : index
    %3 = vector.load %arg1[%c0, %c0_1] : memref<32x128xf32, #tpu.memory_space<vmem>>, vector<32x128xf32>
    %c0_2 = arith.constant 0 : index
    %c0_3 = arith.constant 0 : index
    %4 = vector.load %arg2[%c0_2, %c0_3] : memref<32x128xi8, #tpu.memory_space<vmem>>, vector<32x128xi8>
    %5 = arith.sitofp %4 : vector<32x128xi8> to vector<32x128xf32>
    %6 = math.log %3 : vector<32x128xf32>
    %cst = arith.constant -1.000000e+02 : f32
    %7 = vector.broadcast %cst : f32 to vector<32x128xf32>
    %8 = arith.maximumf %6, %7 : vector<32x128xf32>
    %cst_4 = arith.constant 1.000000e+00 : f32
    %9 = vector.broadcast %cst_4 : f32 to vector<32x128xf32>
    %10 = arith.subf %9, %3 : vector<32x128xf32>
    %11 = math.log %10 : vector<32x128xf32>
    %cst_5 = arith.constant -1.000000e+02 : f32
    %12 = vector.broadcast %cst_5 : f32 to vector<32x128xf32>
    %13 = arith.maximumf %11, %12 : vector<32x128xf32>
    %14 = arith.mulf %5, %8 : vector<32x128xf32>
    %cst_6 = arith.constant 1.000000e+00 : f32
    %15 = vector.broadcast %cst_6 : f32 to vector<32x128xf32>
    %16 = arith.subf %15, %5 : vector<32x128xf32>
    %17 = arith.mulf %16, %13 : vector<32x128xf32>
    %18 = arith.addf %14, %17 : vector<32x128xf32>
    %cst_7 = arith.constant 0.000000e+00 : f32
    %19 = vector.broadcast %cst_7 : f32 to vector<32x128xf32>
    %20 = arith.subf %19, %18 : vector<32x128xf32>
    %21 = vector.shape_cast %20 : vector<32x128xf32> to vector<4x8x128xf32>
    %cst_8 = arith.constant dense<0.000000e+00> : vector<8x128xf32>
    %22 = vector.multi_reduction <add>, %21, %cst_8 [0] : vector<4x8x128xf32> to vector<8x128xf32>
    %cst_9 = arith.constant 6.10351563E-5 : f32
    %23 = vector.broadcast %cst_9 : f32 to vector<8x128xf32>
    %24 = arith.mulf %23, %22 : vector<8x128xf32>
    %c0_10 = arith.constant 0 : index
    %c0_11 = arith.constant 0 : index
    %25 = vector.load %arg3[%c0_10, %c0_11] : memref<32x128xf32, #tpu.memory_space<vmem>>, vector<32x128xf32>
    %26 = tpu.iota {dimensions = array<i32: 0>} : vector<32x128xi32>
    %c32_i32 = arith.constant 32 : i32
    %27 = arith.muli %arg0, %c32_i32 : i32
    %28 = vector.broadcast %27 : i32 to vector<32x128xi32>
    %29 = arith.addi %28, %26 : vector<32x128xi32>
    %c125_i32 = arith.constant 125 : i32
    %30 = vector.broadcast %c125_i32 : i32 to vector<32x128xi32>
    %31 = arith.cmpi slt, %29, %30 : vector<32x128xi32>
    %cst_12 = arith.constant 0.000000e+00 : f32
    %32 = vector.broadcast %cst_12 : f32 to vector<32x128xf32>
    %33 = arith.select %31, %25, %32 : vector<32x128xi1>, vector<32x128xf32>
    %34 = vector.shape_cast %33 : vector<32x128xf32> to vector<4x8x128xf32>
    %cst_13 = arith.constant dense<0.000000e+00> : vector<8x128xf32>
    %35 = vector.multi_reduction <add>, %34, %cst_13 [0] : vector<4x8x128xf32> to vector<8x128xf32>
    %cst_14 = arith.constant 0.00999999977 : f32
    %36 = vector.broadcast %cst_14 : f32 to vector<8x128xf32>
    %37 = arith.mulf %36, %35 : vector<8x128xf32>
    %38 = arith.addf %24, %37 : vector<8x128xf32>
    %c0_15 = arith.constant 0 : index
    %c0_16 = arith.constant 0 : index
    %39 = vector.load %arg4[%c0_15, %c0_16] : memref<16x128xf32, #tpu.memory_space<vmem>>, vector<16x128xf32>
    %c0_17 = arith.constant 0 : index
    %c0_18 = arith.constant 0 : index
    %40 = vector.load %arg5[%c0_17, %c0_18] : memref<16x128xf32, #tpu.memory_space<vmem>>, vector<16x128xf32>
    %cst_19 = arith.constant 1.000000e+00 : f32
    %41 = vector.broadcast %cst_19 : f32 to vector<16x128xf32>
    %42 = arith.addf %41, %40 : vector<16x128xf32>
    %43 = arith.mulf %39, %39 : vector<16x128xf32>
    %44 = arith.subf %42, %43 : vector<16x128xf32>
    %45 = math.exp %40 : vector<16x128xf32>
    %46 = arith.subf %44, %45 : vector<16x128xf32>
    %47 = tpu.iota {dimensions = array<i32: 0>} : vector<16x128xi32>
    %c16_i32 = arith.constant 16 : i32
    %48 = arith.muli %arg0, %c16_i32 : i32
    %49 = vector.broadcast %48 : i32 to vector<16x128xi32>
    %50 = arith.addi %49, %47 : vector<16x128xi32>
    %c16_i32_20 = arith.constant 16 : i32
    %51 = vector.broadcast %c16_i32_20 : i32 to vector<16x128xi32>
    %52 = arith.cmpi slt, %50, %51 : vector<16x128xi32>
    %cst_21 = arith.constant 0.000000e+00 : f32
    %53 = vector.broadcast %cst_21 : f32 to vector<16x128xf32>
    %54 = arith.select %52, %46, %53 : vector<16x128xi1>, vector<16x128xf32>
    %55 = vector.shape_cast %54 : vector<16x128xf32> to vector<2x8x128xf32>
    %cst_22 = arith.constant dense<0.000000e+00> : vector<8x128xf32>
    %56 = vector.multi_reduction <add>, %55, %cst_22 [0] : vector<2x8x128xf32> to vector<8x128xf32>
    %cst_23 = arith.constant -2.44140625E-4 : f32
    %57 = vector.broadcast %cst_23 : f32 to vector<8x128xf32>
    %58 = arith.mulf %57, %56 : vector<8x128xf32>
    %59 = arith.addf %38, %58 : vector<8x128xf32>
    %c0_24 = arith.constant 0 : index
    %c0_25 = arith.constant 0 : index
    %60 = vector.load %arg6[%c0_24, %c0_25] : memref<8x128xf32, #tpu.memory_space<vmem>>, vector<8x128xf32>
    %61 = arith.addf %60, %59 : vector<8x128xf32>
    %c0_26 = arith.constant 0 : index
    %c0_27 = arith.constant 0 : index
    %62 = vector.load %arg6[%c0_26, %c0_27] : memref<8x128xf32, #tpu.memory_space<vmem>>, vector<8x128xf32>
    tpu.vector_store %arg6[%c0_26, %c0_27], %61 {strides = array<i32>} : memref<8x128xf32, #tpu.memory_space<vmem>>, vector<8x128xf32>,
    return
  }
  func.func @transform_0(%arg0: i32) -> (i32, i32) {
    %c0_i32 = arith.constant 0 : i32
    %c0_i32_0 = arith.constant 0 : i32
    return %arg0, %c0_i32 : i32, i32
  }
  func.func @transform_1(%arg0: i32) -> (i32, i32) {
    %c0_i32 = arith.constant 0 : i32
    %c0_i32_0 = arith.constant 0 : i32
    return %arg0, %c0_i32 : i32, i32
  }
  func.func @transform_2(%arg0: i32) -> (i32, i32) {
    %c0_i32 = arith.constant 0 : i32
    %c0_i32_0 = arith.constant 0 : i32
    return %arg0, %c0_i32 : i32, i32
  }
  func.func @transform_3(%arg0: i32) -> (i32, i32) {
    %c0_i32 = arith.constant 0 : i32
    %0 = arith.minsi %arg0, %c0_i32 : i32
    %c0_i32_0 = arith.constant 0 : i32
    %c0_i32_1 = arith.constant 0 : i32
    return %0, %c0_i32_0 : i32, i32
  }
  func.func @transform_4(%arg0: i32) -> (i32, i32) {
    %c0_i32 = arith.constant 0 : i32
    %0 = arith.minsi %arg0, %c0_i32 : i32
    %c0_i32_0 = arith.constant 0 : i32
    %c0_i32_1 = arith.constant 0 : i32
    return %0, %c0_i32_0 : i32, i32
  }
  func.func @transform_5(%arg0: i32) -> (i32, i32) {
    %c0_i32 = arith.constant 0 : i32
    %c0_i32_0 = arith.constant 0 : i32
    %c0_i32_1 = arith.constant 0 : i32
    return %c0_i32, %c0_i32_0 : i32, i32
  }
}

</mosaic_0001>

<bundles_post_ra>
// kernel: my_loss_function.1
= control target key start
LH: loop header
LB: loop body
LE: loop exit
PB: predicated region body
PF: predicated region fallthrough
CT: control target
= control target key end

     0   :  { %s613_s18 = smov 0   ;;  %s701_s0 = inlined_call_operand.vmem [shape: f32[128,128], index: 0, kind: input, shape index: {}]   ;;  %s702_s1 = inlined_call_operand.vmem [shape: s8[128,128], index: 1, kind: input, shape index: {}]   ;;  %s703_s2 = inlined_call_operand.vmem [shape: f32[125,128], index: 2, kind: input, shape index: {}]   ;;  %s704_s3 = inlined_call_operand.vmem [shape: f32[16,128], index: 3, kind: input, shape index: {}]   ;;  %s705_s4 = inlined_call_operand.vmem [shape: f32[16,128], index: 4, kind: input, shape index: {}]   ;;  %s706_s5 = inlined_call_operand.vmem [shape: f32[8,128], index: 5, kind: output, shape index: {}]  }
   0x1 LB: > { %s619_s19 = sadd.s32 4294967295, %s580_s18   ;;  %p530_p0 = scmp.ge.s32.totalorder %s580_s18, 1  ;;  %s580_s18 = sphi %s613_s18, %s15_s18  }
   0x2   : > { %p241_p1 = scmp.lt.s32.totalorder %s580_s18, 5 }
   0x4   : > { %p242_p2 = pnand %p530_p0, %p241_p1 }
   0x5   : > { %s531_s20 = sshll.u32 (!%p242_p2), %s619_s19, 2  ;;  %p293_p3 = scmp.lt.s32.totalorder (!%p242_p2), %s619_s19, 3 }
   0x6   : > { %245 = sbr.rel (%p242_p2) target bundleno = 65 (0x41), region = 40  ;;  %p288_p4 = scmp.lt.s32.totalorder (!%p242_p2), %s531_s20, 15 }
   0x7   : > { %p303_p5 = scmp.lt.s32.totalorder (!%p242_p2), %s619_s19, 0  ;;  %p540_p7 = scmp.ne.s32.totalorder (!%p242_p2), %s619_s19, 0 }
   0xb   : > { %s294_s21 = scalar_select %p293_p3, %s619_s19, 3 }
   0xc   : > { %s708_s20 = smov (!%p288_p4, %s531_s20), 15 }
   0xd   : > { %s533_s22 = sshll.u32 %s294_s21, 3  ;;  %s532_s23 = sshll.u32 %s708_s20, 3 }
   0xe   : > { %s296_s26 = scalar_lea.vmem %s702_s1, %s533_s22  ;;  %s291_s29 = scalar_lea.vmem %s701_s0, %s532_s23 }
   0xf   : > { %s636_s7 = scalar_lea.vmem %s703_s2, %s532_s23 }
  0x10   : > { %s304_s8 = scalar_select %p303_p5, %s619_s19, 0 }
  0x12   : > { %s536_s9 = sshll.u32 %s304_s8, 1 }
  0x13   : > { %p306_p6 = scmp.lt.s32.totalorder %s536_s9, 1  ;;  %326 = sbr.rel (%p540_p7) target bundleno = 26 (0x1a), region = 44 }
  0x15   : > { %s710_s9 = smov (!%p306_p6, %s536_s9), 1 }
  0x16   : > { %s537_s10 = sshll.u32 %s710_s9, 3 }
  0x17   : > { %s642_s13 = scalar_lea.vmem %s704_s3, %s537_s10  ;;  %s647_s16 = scalar_lea.vmem %s705_s4, %s537_s10 }
  0x18   : > { %v582_v0 = vmov 0.0  }
  0x19   : > { %327 = vst [vmem:[%s706_s5] sm:$0xff] %v582_v0 }
  0x1a PF: > { %v328_v1 = vld [vmem:[%s291_s29] sm:$0xff]  ;;  %v397_v2 = vlaneseq  ;;  %v329_v3 = vld [vmem:[%s291_s29 + $0x8] sm:$0xff]  ;;  %v330_v4 = vld [vmem:[%s291_s29 + $0x10] sm:$0xff]  ;;  %s541_s21 = sshll.u32 %s619_s19, 5  ;;  %s542_s22 = sshll.u32 %s619_s19, 4 }
  0x1b   : > { %v332_v5 = vld [vmem:[%s296_s26] sm:$0xff]  ;;  %554 = vlog2.f32 %v328_v1  ;;  %v331_v7 = vld [vmem:[%s291_s29 + $0x18] sm:$0xff]  ;;  %v353_v9 = vsub.f32 1.0, %v328_v1  ;;  %v354_v12 = vsub.f32 1.0, %v329_v3  ;;  %v355_v13 = vsub.f32 1.0, %v330_v4  ;;  %v394_v31 = vld [vmem:[%s636_s7 + $0x8] sm:$0xff] }
  0x1c   : > { %v333_v6 = vunpack.c.0.s8 %v332_v5  ;;  %v334_v8 = vunpack.c.1.s8 %v332_v5  ;;  %556 = vlog2.f32 %v329_v3  ;;  %v654_v10 = vshrl.u32 %v397_v2, 7  ;;  %v393_v30 = vld [vmem:[%s636_s7] sm:$0xff]  ;;  %v395_v38 = vld [vmem:[%s636_s7 + $0x10] sm:$0xff]  ;;  %v424_v60 = vld [vmem:[%s647_s16 + $0x8] sm:$0xff] }
  0x1d   : > { %v335_v11 = vunpack.c.2.s8 %v332_v5  ;;  %v403_v14 = vstv %s541_s21  ;;  %v336_v15 = vunpack.c.3.s8 %v332_v5  ;;  %558 = vlog2.f32 %v330_v4  ;;  %v423_v44 = vld [vmem:[%s647_s16] sm:$0xff] }
  0x1e   : > { %v657_v16 = vadd.s32 8, %v654_v10  ;;  %v400_v17 = vadd.s32 16, %v654_v10  ;;  %v660_v18 = vcvt.s32.f32 %v333_v6  ;;  %560 = vlog2.f32 %v331_v7  ;;  %v421_v49 = vld [vmem:[%s642_s13] sm:$0xff]  ;;  %v422_v6 = vld [vmem:[%s642_s13 + $0x8] sm:$0xff] }
  0x1f   : > { %v356_v19 = vsub.f32 1.0, %v331_v7  ;;  %v401_v20 = vadd.s32 24, %v654_v10  ;;  %v663_v22 = vcvt.s32.f32 %v334_v8  ;;  %562 = vlog2.f32 %v353_v9 }
  0x20   : > { %v404_v23 = vadd.s32 %v403_v14, %v654_v10  ;;  %v405_v24 = vadd.s32 %v403_v14, %v657_v16  ;;  %v667_v25 = vcvt.s32.f32 %v335_v11  ;;  %564 = vlog2.f32 %v354_v12 }
  0x21   : > { %v555_v21 = vpop.eup %554  ;;  %v406_v27 = vadd.s32 %v403_v14, %v400_v17  ;;  %v669_v29 = vcvt.s32.f32 %v336_v15  ;;  %566 = vlog2.f32 %v355_v13  ;;  %v407_v33 = vadd.s32 %v403_v14, %v401_v20  ;;  %v396_v15 = vld [vmem:[%s636_s7 + $0x18] sm:$0xff] }
  0x22   : > { %v342_v26 = vmul.f32 0.6931472, %v555_v21  ;;  %v557_v28 = vpop.eup %556  ;;  %vm408_vm0 = vcmp.lt.s32.totalorder %v404_v23, 125  ;;  %vm409_vm1 = vcmp.lt.s32.totalorder %v405_v24, 125  ;;  %568 = vlog2.f32 %v356_v19 }
  0x23   : > { %v344_v32 = vmul.f32 0.6931472, %v557_v28  ;;  %v559_v34 = vpop.eup %558  ;;  %v373_v36 = vsub.f32 1.0, %v660_v18  ;;  %v374_v37 = vsub.f32 1.0, %v663_v22  ;;  %vm410_vm2 = vcmp.lt.s32.totalorder %v406_v27, 125 }
  0x24   : > { %v349_v35 = vmax.f32 %v342_v26, -100.0  ;;  %v561_v39 = vpop.eup %560  ;;  %v346_v40 = vmul.f32 0.6931472, %v559_v34  ;;  %v375_v41 = vsub.f32 1.0, %v667_v25  ;;  %v412_v42 = vsel %vm408_vm0, %v393_v30, 0.0 }
  0x25   : > { %v413_v43 = vsel %vm409_vm1, %v394_v31, 0.0  ;;  %v563_v45 = vpop.eup %562  ;;  %v348_v46 = vmul.f32 0.6931472, %v561_v39  ;;  %v350_v47 = vmax.f32 %v344_v32, -100.0  ;;  %v376_v48 = vsub.f32 1.0, %v669_v29 }
  0x26   : > { %v425_v50 = vadd.f32 1.0, %v423_v44  ;;  %v565_v51 = vpop.eup %564  ;;  %v351_v52 = vmax.f32 %v346_v40, -100.0  ;;  %v358_v53 = vmul.f32 0.6931472, %v563_v45  ;;  %vm411_vm3 = vcmp.lt.s32.totalorder %v407_v33, 125 }
  0x27   : > { %v414_v54 = vsel %vm410_vm2, %v395_v38, 0.0  ;;  %v567_v55 = vpop.eup %566  ;;  %v352_v56 = vmax.f32 %v348_v46, -100.0  ;;  %v360_v57 = vmul.f32 0.6931472, %v565_v51  ;;  %v369_v58 = vmul.f32 %v349_v35, %v660_v18 }
  0x28   : > { %v416_v59 = vadd.f32 %v413_v43, %v412_v42  ;;  %v569_v61 = vpop.eup %568  ;;  %v362_v62 = vmul.f32 0.6931472, %v567_v55  ;;  %v365_v63 = vmax.f32 %v358_v53, -100.0  ;;  %v426_v0 = vadd.f32 1.0, %v424_v60 }
  0x29   : > { %v427_v1 = vmul.f32 %v421_v49, %v421_v49  ;;  %v364_v2 = vmul.f32 0.6931472, %v569_v61  ;;  %v366_v3 = vmax.f32 %v360_v57, -100.0  ;;  %v370_v4 = vmul.f32 %v350_v47, %v663_v22 }
  0x2a   : > { %v371_v5 = vmul.f32 %v351_v52, %v667_v25  ;;  %v367_v7 = vmax.f32 %v362_v62, -100.0  ;;  %v377_v8 = vmul.f32 %v373_v36, %v365_v63  ;;  %v431_v9 = vmul.f32 1.442695, %v423_v44 }
  0x2b   : > { %v433_v11 = vmul.f32 1.442695, %v424_v60  ;;  %v368_v12 = vmax.f32 %v364_v2, -100.0  ;;  %v372_v13 = vmul.f32 %v352_v56, %v669_v29  ;;  %v378_v14 = vmul.f32 %v374_v37, %v366_v3 }
  0x2c   : > { %v438_v17 = vstv %s542_s22  ;;  %v379_v18 = vmul.f32 %v375_v41, %v367_v7  ;;  %v381_v19 = vadd.f32 %v377_v8, %v369_v58  ;;  %v428_v20 = vmul.f32 %v422_v6, %v422_v6 }
  0x2d   : > { %570 = vpow2.f32 %v431_v9  ;;  %v380_v21 = vmul.f32 %v376_v48, %v368_v12  ;;  %v382_v23 = vadd.f32 %v378_v14, %v370_v4  ;;  %v417_v22 = vadd.f32 %v416_v59, %v414_v54  ;;  %v448_v48 = vld [vmem:[%s706_s5] sm:$0xff] }
  0x2e   : > { %572 = vpow2.f32 %v433_v11  ;;  %v383_v24 = vadd.f32 %v379_v18, %v371_v5  ;;  %v385_v25 = vsub.f32 0.0, %v381_v19  ;;  %v415_v26 = vsel %vm411_vm3, %v396_v15, 0.0 }
  0x2f   : > { %v439_v27 = vadd.s32 %v438_v17, %v654_v10  ;;  %v384_v28 = vadd.f32 %v380_v21, %v372_v13  ;;  %v386_v30 = vsub.f32 0.0, %v382_v23  ;;  %v429_v29 = vsub.f32 %v425_v50, %v427_v1 }
  0x30   : > { %v440_v31 = vadd.s32 %v438_v17, %v657_v16  ;;  %v387_v32 = vsub.f32 0.0, %v383_v24  ;;  %v430_v34 = vsub.f32 %v426_v0, %v428_v20  ;;  %v418_v37 = vadd.f32 %v417_v22, %v415_v26 }
  0x31   : > { %v388_v35 = vsub.f32 0.0, %v384_v28  ;;  %v389_v36 = vadd.f32 %v386_v30, %v385_v25  ;;  %vm441_vm4 = vcmp.lt.s32.totalorder %v439_v27, 16 }
  0x32   : > { %vm442_vm5 = vcmp.lt.s32.totalorder %v440_v31, 16  ;;  %v419_v43 = vmul.f32 0.01, %v418_v37 }
  0x33   : > { %v571_v38 = vpop.eup %570  ;;  %v390_v40 = vadd.f32 %v389_v36, %v387_v32 }
  0x34   : > { %v573_v39 = vpop.eup %572  ;;  %v435_v41 = vsub.f32 %v429_v29, %v571_v38 }
  0x35   : > { %v436_v33 = vsub.f32 %v430_v34, %v573_v39  ;;  %v391_v42 = vadd.f32 %v390_v40, %v388_v35 }
  0x36   : > { %v443_v10 = vsel %vm441_vm4, %v435_v41, 0.0 }
  0x37   : > { %v444_v44 = vsel %vm442_vm5, %v436_v33, 0.0  ;;  %v392_v45 = vmul.f32 6.1035156e-05, %v391_v42 }
  0x38   : > { %v445_v46 = vadd.f32 %v444_v44, %v443_v10 }
  0x39   : > { %v420_v47 = vadd.f32 %v419_v43, %v392_v45 }
  0x3a   : > { %v446_v16 = vmul.f32 -0.00024414063, %v445_v46 }
  0x3c   : > { %v447_v49 = vadd.f32 %v446_v16, %v420_v47 }
  0x3e   : > { %v449_v50 = vadd.f32 %v448_v48, %v447_v49 }
  0x40   : > { %450 = vst [vmem:[%s706_s5] sm:$0xff] %v449_v50 }
  0x41 PF: > { %s15_s18 = sadd.s32 1, %s580_s18  }
  0x42   : > { %p12_p8 = scmp.ge.s32.totalorder %s15_s18, 6  }
  0x44   :  { %14 = sbr.rel (!%p12_p8) target bundleno = 1 (0x1), region = 82 }

</bundles_post_ra>
